<compile_context>
chip_gen: v5e
topology: v5e:2x2
jax: 0.10.0
libtpu: 0.0.40
codegen_flags: <defaults>
</compile_context>

<pallas_src>
import functools

import jax
import jax.numpy as jnp
from jax import lax
from jax.experimental import pallas as pl
from jax.experimental.pallas import tpu as pltpu


# ----------------------------------------------------------------------------
# Kernel
# ----------------------------------------------------------------------------
def _isdh_kernel(u_ref, y_ref, yn_ref, Ut_ref, Yt_ref, o_ref, acc_ref, *,
                 q, num_train):
    step = pl.program_id(1)

    @pl.when(step == 0)
    def _():
        acc_ref[...] = jnp.zeros_like(acc_ref)

    tile_n = acc_ref.shape[1]
    # global column (training-row) offset of this tile
    base = (pl.program_id(0) * pl.num_programs(1) + step) * tile_n

    # s_raw = y @ Y_tile   (B, tn): bf16 x bf16 -> f32 on the MXU, lane-dense RHS.
    s_raw = jnp.dot(y_ref[...], Yt_ref[...], preferred_element_type=jnp.float32)

    # ||Y_row|| computed in-kernel from the resident (n_class, tn) tile
    # (sublane reduction over the 16-wide class axis -> XLU/VPU filler).
    Yf = Yt_ref[...].astype(jnp.float32)
    Yn = jnp.sqrt(jnp.sum(Yf * Yf, axis=0, keepdims=True))        # (1, tn)
    denom = yn_ref[...] * Yn + 1e-5                                # (B, tn)

    # M in {0,1}: decide the mask on un-divided quantities; the approximate
    # reciprocal is only used for the value of s.
    mask = (s_raw > 0.99 * denom) | (s_raw < 0.01 * denom)
    s = s_raw * pl.reciprocal(denom, approx=True)

    # inner_product = 5/q * u @ U_tile   (B, tn)
    ip = (5.0 / q) * jnp.dot(u_ref[...], Ut_ref[...],
                             preferred_element_type=jnp.float32)

    # Single exp shared by the stable log-loss and the sigmoid.
    e = jnp.exp(-jnp.abs(ip))
    one_pe = 1.0 + e
    log_loss = jnp.log(one_pe) + jnp.maximum(ip, 0.0) - s * ip
    sig = jnp.where(ip >= 0.0, 1.0, e) * pl.reciprocal(one_pe, approx=True)
    mse_loss = (s - sig) ** 2

    # 10*M*log_loss + (1-M)*mse_loss  ==  where(M, 10*log_loss, mse_loss)
    contrib = jnp.where(mask, 10.0 * log_loss, mse_loss)

    # Ragged tail: padded (all-zero) columns are NOT neutral (s=0 -> mask-true
    # branch -> 10*log 2 each), so mask out columns >= num_train explicitly.
    col = base + lax.broadcasted_iota(jnp.int32, contrib.shape, 1)
    acc_ref[...] += jnp.where(col < num_train, contrib, 0.0)

    @pl.when(step == pl.num_programs(1) - 1)
    def _():
        o_ref[...] = jnp.sum(acc_ref[...]).reshape(1, 1, 1)


# ----------------------------------------------------------------------------
# State / tiling helpers
# ----------------------------------------------------------------------------
def _round_up(x, m):
    return ((x + m - 1) // m) * m


def _default_num_parallel():
    """2 grid-parallel shards on v7x (2 TCs/chip), 1 elsewhere."""
    try:
        kind = jax.devices()[0].device_kind.lower()
        return 2 if "v7" in kind else 1
    except Exception:  # pragma: no cover
        return 1


def _pick_tile_n(num_train, num_parallel, bit, n_class, batch=8,
                 vmem_budget_bytes=8 << 20, cap=16384):
    """Largest power-of-two tile that fits a modest VMEM budget and does not
    pad far beyond one tile per core."""
    # per streamed column: double-buffered bf16 U/Y tiles + f32 accumulator row
    per_col = 2 * 2 * (bit + n_class) + 4 * batch
    cap = min(cap, max(128, (vmem_budget_bytes // per_col) // 128 * 128))
    per_core = _round_up(max(1, -(-num_train // num_parallel)), 128)
    t = 128
    while t * 2 <= cap and t < per_core:
        t *= 2
    return t


def init_isdh_state(num_train, bit, n_class, *, num_parallel=1, tile_n=None):
    """Create the persistent ISDH buffers: feature-major, bf16, zero-padded to
    a multiple of num_parallel * tile_n.  The bf16 cast happens exactly once
    (here); per-call updates scatter bf16 columns in place."""
    if tile_n is None:
        tile_n = _pick_tile_n(num_train, num_parallel, bit, n_class)
    chunk = num_parallel * tile_n
    n_pad = _round_up(num_train, chunk)
    U_T = jnp.zeros((bit, n_pad), jnp.bfloat16)
    Y_T = jnp.zeros((n_class, n_pad), jnp.bfloat16)
    return U_T, Y_T, tile_n


# ----------------------------------------------------------------------------
# Forward pass
# ----------------------------------------------------------------------------
@functools.partial(jax.jit,
                   static_argnames=("bit", "num_train", "tile_n", "num_parallel"),
                   donate_argnames=("U_T", "Y_T"))
def isdh_loss(u_raw, y, ind, U_T, Y_T, *, bit, num_train, tile_n,
              num_parallel=1):
    """Functional equivalent of ISDHLoss.forward.

    Returns (loss, U_T_new, Y_T_new).  U_T / Y_T are donated so the 8-row
    column scatter happens in place (no full-buffer HBM copy per call)."""
    u_f32 = (u_raw / (jnp.abs(u_raw) + 1.0)).astype(jnp.float32)
    y_f32 = y.astype(jnp.float32)
    u_bf = u_f32.astype(jnp.bfloat16)
    y_bf = y_f32.astype(jnp.bfloat16)

    # module-buffer in-place updates (self.U[ind]=u ; self.Y[ind]=y):
    # column scatter into the donated, feature-major bf16 buffers.
    U_T = U_T.at[:, ind].set(u_bf.T)
    Y_T = Y_T.at[:, ind].set(y_bf.T)

    B, nbit = u_f32.shape
    n_class = y_f32.shape[1]
    n_pad = U_T.shape[1]

    # Loop-invariant batch row norms (tiny (B,1) side input).
    yn = jnp.sqrt(jnp.sum(y_f32 * y_f32, axis=1, keepdims=True))

    assert tile_n % 128 == 0
    assert n_pad % (num_parallel * tile_n) == 0, (n_pad, num_parallel, tile_n)
    per_core = n_pad // num_parallel
    n_steps = per_core // tile_n
    grid = (num_parallel, n_steps)

    # Actual VMEM requirement (+100% headroom), NOT the full physical VMEM.
    vmem_need = (2 * 2 * (nbit + n_class) * tile_n      # dbl-buffered bf16 U/Y tiles
                 + 4 * B * tile_n                       # f32 accumulator scratch
                 + 2 * B * (nbit + n_class) + 4 * B)    # resident u / y / ||y||
    vmem_limit = int(min(48 << 20, max(8 << 20, 2 * vmem_need)))

    kernel = functools.partial(_isdh_kernel, q=float(bit), num_train=num_train)
    partial_sums = pl.pallas_call(
        kernel,
        out_shape=jax.ShapeDtypeStruct((num_parallel, 1, 1), jnp.float32),
        grid_spec=pltpu.PrefetchScalarGridSpec(
            num_scalar_prefetch=0,
            grid=grid,
            in_specs=[
                pl.BlockSpec((B, nbit), lambda p, i: (0, 0)),       # u   (resident, bf16)
                pl.BlockSpec((B, n_class), lambda p, i: (0, 0)),    # y   (resident, bf16)
                pl.BlockSpec((B, 1), lambda p, i: (0, 0)),          # ||y|| rows (f32)
                pl.BlockSpec((nbit, tile_n),                        # U^T tile (bf16, lane-dense)
                             lambda p, i: (0, p * n_steps + i)),
                pl.BlockSpec((n_class, tile_n),                     # Y^T tile (bf16, lane-dense)
                             lambda p, i: (0, p * n_steps + i)),
            ],
            out_specs=pl.BlockSpec((1, 1, 1), lambda p, i: (p, 0, 0)),
            scratch_shapes=[pltpu.VMEM((B, tile_n), jnp.float32)],
        ),
        compiler_params=pltpu.CompilerParams(
            dimension_semantics=("parallel", "arbitrary"),
            vmem_limit_bytes=vmem_limit,
        ),
    )(u_bf, y_bf, yn, U_T, Y_T)

    # Mean over the TRUE (B x num_train) matrix; padded columns were masked.
    loss1 = jnp.sum(partial_sums) / jnp.float32(B * num_train)
    # loss2 is a tiny (B, bit) reduction; done in f32 in plain JAX.
    loss2 = 0.1 * jnp.mean(jnp.abs(jnp.abs(u_f32) - 1.0))
    return loss1 + loss2, U_T, Y_T


# ----------------------------------------------------------------------------
# Plain-JAX reference (transcription of the PyTorch forward)
# ----------------------------------------------------------------------------
def reference(u_raw, y, ind, U0, Y0, bit):
    u = u_raw / (jnp.abs(u_raw) + 1.0)
    y = y.astype(jnp.float32)
    U = U0.at[ind].set(u)
    Y = Y0.at[ind].set(y)
    s = y @ Y.T
    norm = (jnp.sqrt(jnp.sum(y ** 2, axis=1, keepdims=True))
            @ jnp.sqrt(jnp.sum(Y ** 2, axis=1, keepdims=True)).T)
    s = s / (norm + 1e-5)
    M = (s > 0.99).astype(jnp.float32) + (s < 0.01).astype(jnp.float32)
    ip = (5.0 / bit) * (u @ U.T)
    log_loss = jnp.log(1.0 + jnp.exp(-jnp.abs(ip))) + jnp.maximum(ip, 0.0) - s * ip
    mse_loss = (s - jax.nn.sigmoid(ip)) ** 2
    loss1 = jnp.mean(10.0 * M * log_loss + (1.0 - M) * mse_loss)
    loss2 = 0.1 * jnp.mean(jnp.abs(jnp.abs(u) - 1.0))
    return loss1 + loss2


if __name__ == "__main__":
    # Ragged num_train (not a tile multiple) exercises the padding + masking path.
    B, bit, n_class, num_train = 8, 32, 16, 1000

    key = jax.random.PRNGKey(0)
    k1, k2, k3 = jax.random.split(key, 3)
    u_raw = jax.random.normal(k1, (B, bit), jnp.float32)
    y = (jax.random.uniform(k2, (B, n_class)) < 0.3).astype(jnp.float32)
    ind = jax.random.permutation(k3, num_train)[:B]

    num_parallel = _default_num_parallel()          # 2 only on v7x, else 1
    U_T, Y_T, tile_n = init_isdh_state(num_train, bit, n_class,
                                       num_parallel=num_parallel, tile_n=256)

    loss, U_T, Y_T = isdh_loss(u_raw, y, ind, U_T, Y_T,
                               bit=bit, num_train=num_train,
                               tile_n=tile_n, num_parallel=num_parallel)
    loss = jax.block_until_ready(loss)

    # Reference uses fresh zero buffers (module __init__ state), row-major f32.
    U0 = jnp.zeros((num_train, bit), jnp.float32)
    Y0 = jnp.zeros((num_train, n_class), jnp.float32)
    ref = jax.block_until_ready(reference(u_raw, y, ind, U0, Y0, bit))

    # bf16 streaming of u/U/y/Y and approx reciprocals -> small, bounded deviation.
    tol = 2e-3 * max(1.0, abs(float(ref)))
    assert abs(float(loss) - float(ref)) < tol, (float(loss), float(ref))

    print("KERNEL_OK")
</pallas_src>

<mosaic_0001>
module attributes {stable_mosaic.version = 11 : i64} {
  func.func @_isdh_kernel(%arg0: i32, %arg1: i32, %arg2: memref<8x32xbf16, #tpu.memory_space<vmem>>, %arg3: memref<8x16xbf16, #tpu.memory_space<vmem>>, %arg4: memref<8x1xf32, #tpu.memory_space<vmem>>, %arg5: memref<32x256xbf16, #tpu.memory_space<vmem>>, %arg6: memref<16x256xbf16, #tpu.memory_space<vmem>>, %arg7: memref<1x1x1xf32, #tpu.memory_space<vmem>>, %arg8: memref<8x256xf32, #tpu.memory_space<vmem>>) attributes {dimension_semantics = [#tpu.dimension_semantics<parallel>, #tpu.dimension_semantics<arbitrary>], iteration_bounds = array<i64: 1, 4>, scalar_prefetch = 0 : i64, scratch_operands = 1 : i64, tpu.core_type = #tpu.core_type<tc>, window_params = [{pipeline_mode = #tpu.pipeline_mode<synchronous>, transform_indices = @transform_0, window_bounds = array<i64: 8, 32>}, {pipeline_mode = #tpu.pipeline_mode<synchronous>, transform_indices = @transform_1, window_bounds = array<i64: 8, 16>}, {pipeline_mode = #tpu.pipeline_mode<synchronous>, transform_indices = @transform_2, window_bounds = array<i64: 8, 1>}, {transform_indices = @transform_3, window_bounds = array<i64: 32, 256>}, {transform_indices = @transform_4, window_bounds = array<i64: 16, 256>}, {transform_indices = @transform_5, window_bounds = array<i64: 1, 1, 1>}]} {
    %c0_i32 = arith.constant 0 : i32
    %0 = arith.cmpi eq, %arg1, %c0_i32 : i32
    %1 = arith.extui %0 : i1 to i32
    %c0_i32_0 = arith.constant 0 : i32
    %2 = arith.cmpi ne, %1, %c0_i32_0 : i32
    scf.if %2 {
      %cst_30 = arith.constant 0.000000e+00 : f32
      %71 = vector.broadcast %cst_30 : f32 to vector<8x256xf32>
      %c0_31 = arith.constant 0 : index
      %c0_32 = arith.constant 0 : index
      %72 = vector.load %arg8[%c0_31, %c0_32] : memref<8x256xf32, #tpu.memory_space<vmem>>, vector<8x256xf32>
      tpu.vector_store %arg8[%c0_31, %c0_32], %71 {strides = array<i32>} : memref<8x256xf32, #tpu.memory_space<vmem>>, vector<8x256xf32>,
    } else {
    }
    %c4_i32 = arith.constant 4 : i32
    %3 = arith.muli %arg0, %c4_i32 : i32
    %4 = arith.addi %3, %arg1 : i32
    %c256_i32 = arith.constant 256 : i32
    %5 = arith.muli %4, %c256_i32 : i32
    %c0 = arith.constant 0 : index
    %c0_1 = arith.constant 0 : index
    %6 = vector.load %arg3[%c0, %c0_1] : memref<8x16xbf16, #tpu.memory_space<vmem>>, vector<8x16xbf16>
    %c0_2 = arith.constant 0 : index
    %c0_3 = arith.constant 0 : index
    %7 = vector.load %arg6[%c0_2, %c0_3] : memref<16x256xbf16, #tpu.memory_space<vmem>>, vector<16x256xbf16>
    %cst = arith.constant dense<0.000000e+00> : vector<8x256xf32>
    %8 = tpu.matmul %6, %7, %cst {dimension_numbers = #tpu.dot_dimension_numbers<[1], [0], [0], [1], [0, 0, 1, 1], [], []>} : vector<8x16xbf16>, vector<16x256xbf16>, vector<8x256xf32> -> vector<8x256xf32>
    %c0_4 = arith.constant 0 : index
    %c0_5 = arith.constant 0 : index
    %9 = vector.load %arg6[%c0_4, %c0_5] : memref<16x256xbf16, #tpu.memory_space<vmem>>, vector<16x256xbf16>
    %10 = arith.extf %9 : vector<16x256xbf16> to vector<16x256xf32>
    %11 = arith.mulf %10, %10 : vector<16x256xf32>
    %cst_6 = arith.constant dense<0.000000e+00> : vector<256xf32>
    %12 = vector.multi_reduction <add>, %11, %cst_6 [0] : vector<16x256xf32> to vector<256xf32>
    %13 = vector.shape_cast %12 : vector<256xf32> to vector<1x256xf32>
    %14 = math.sqrt %13 : vector<1x256xf32>
    %c0_7 = arith.constant 0 : index
    %c0_8 = arith.constant 0 : index
    %15 = vector.load %arg4[%c0_7, %c0_8] : memref<8x1xf32, #tpu.memory_space<vmem>>, vector<8x1xf32>
    %16 = vector.broadcast %15 : vector<8x1xf32> to vector<8x256xf32>
    %17 = vector.broadcast %14 : vector<1x256xf32> to vector<8x256xf32>
    %18 = arith.mulf %16, %17 : vector<8x256xf32>
    %cst_9 = arith.constant 9.99999974E-6 : f32
    %19 = vector.broadcast %cst_9 : f32 to vector<8x256xf32>
    %20 = arith.addf %18, %19 : vector<8x256xf32>
    %cst_10 = arith.constant 9.900000e-01 : f32
    %21 = vector.broadcast %cst_10 : f32 to vector<8x256xf32>
    %22 = arith.mulf %21, %20 : vector<8x256xf32>
    %23 = arith.cmpf ogt, %8, %22 : vector<8x256xf32>
    %cst_11 = arith.constant 0.00999999977 : f32
    %24 = vector.broadcast %cst_11 : f32 to vector<8x256xf32>
    %25 = arith.mulf %24, %20 : vector<8x256xf32>
    %26 = arith.cmpf olt, %8, %25 : vector<8x256xf32>
    %27 = arith.ori %23, %26 : vector<8x256xi1>
    %28 = tpu.reciprocal %20 {approx = true} : vector<8x256xf32> -> vector<8x256xf32>
    %29 = arith.mulf %8, %28 : vector<8x256xf32>
    %c0_12 = arith.constant 0 : index
    %c0_13 = arith.constant 0 : index
    %30 = vector.load %arg2[%c0_12, %c0_13] : memref<8x32xbf16, #tpu.memory_space<vmem>>, vector<8x32xbf16>
    %c0_14 = arith.constant 0 : index
    %c0_15 = arith.constant 0 : index
    %31 = vector.load %arg5[%c0_14, %c0_15] : memref<32x256xbf16, #tpu.memory_space<vmem>>, vector<32x256xbf16>
    %cst_16 = arith.constant dense<0.000000e+00> : vector<8x256xf32>
    %32 = tpu.matmul %30, %31, %cst_16 {dimension_numbers = #tpu.dot_dimension_numbers<[1], [0], [0], [1], [0, 0, 1, 1], [], []>} : vector<8x32xbf16>, vector<32x256xbf16>, vector<8x256xf32> -> vector<8x256xf32>
    %cst_17 = arith.constant 1.562500e-01 : f32
    %33 = vector.broadcast %cst_17 : f32 to vector<8x256xf32>
    %34 = arith.mulf %33, %32 : vector<8x256xf32>
    %35 = math.absf %34 : vector<8x256xf32>
    %cst_18 = arith.constant 0.000000e+00 : f32
    %36 = vector.broadcast %cst_18 : f32 to vector<8x256xf32>
    %37 = arith.subf %36, %35 : vector<8x256xf32>
    %38 = math.exp %37 : vector<8x256xf32>
    %cst_19 = arith.constant 1.000000e+00 : f32
    %39 = vector.broadcast %cst_19 : f32 to vector<8x256xf32>
    %40 = arith.addf %39, %38 : vector<8x256xf32>
    %41 = math.log %40 : vector<8x256xf32>
    %cst_20 = arith.constant 0.000000e+00 : f32
    %42 = vector.broadcast %cst_20 : f32 to vector<8x256xf32>
    %43 = arith.maximumf %34, %42 : vector<8x256xf32>
    %44 = arith.addf %41, %43 : vector<8x256xf32>
    %45 = arith.mulf %29, %34 : vector<8x256xf32>
    %46 = arith.subf %44, %45 : vector<8x256xf32>
    %cst_21 = arith.constant 0.000000e+00 : f32
    %47 = vector.broadcast %cst_21 : f32 to vector<8x256xf32>
    %48 = arith.cmpf oge, %34, %47 : vector<8x256xf32>
    %cst_22 = arith.constant 1.000000e+00 : f32
    %49 = vector.broadcast %cst_22 : f32 to vector<8x256xf32>
    %50 = arith.select %48, %49, %38 : vector<8x256xi1>, vector<8x256xf32>
    %51 = tpu.reciprocal %40 {approx = true} : vector<8x256xf32> -> vector<8x256xf32>
    %52 = arith.mulf %50, %51 : vector<8x256xf32>
    %53 = arith.subf %29, %52 : vector<8x256xf32>
    %54 = arith.mulf %53, %53 : vector<8x256xf32>
    %cst_23 = arith.constant 1.000000e+01 : f32
    %55 = vector.broadcast %cst_23 : f32 to vector<8x256xf32>
    %56 = arith.mulf %55, %46 : vector<8x256xf32>
    %57 = arith.select %27, %56, %54 : vector<8x256xi1>, vector<8x256xf32>
    %58 = tpu.iota {dimensions = array<i32: 1>} : vector<8x256xi32>
    %59 = vector.broadcast %5 : i32 to vector<8x256xi32>
    %60 = arith.addi %59, %58 : vector<8x256xi32>
    %c0_24 = arith.constant 0 : index
    %c0_25 = arith.constant 0 : index
    %61 = vector.load %arg8[%c0_24, %c0_25] : memref<8x256xf32, #tpu.memory_space<vmem>>, vector<8x256xf32>
    %c1000_i32 = arith.constant 1000 : i32
    %62 = vector.broadcast %c1000_i32 : i32 to vector<8x256xi32>
    %63 = arith.cmpi slt, %60, %62 : vector<8x256xi32>
    %cst_26 = arith.constant 0.000000e+00 : f32
    %64 = vector.broadcast %cst_26 : f32 to vector<8x256xf32>
    %65 = arith.select %63, %57, %64 : vector<8x256xi1>, vector<8x256xf32>
    %66 = arith.addf %61, %65 : vector<8x256xf32>
    %c0_27 = arith.constant 0 : index
    %c0_28 = arith.constant 0 : index
    %67 = vector.load %arg8[%c0_27, %c0_28] : memref<8x256xf32, #tpu.memory_space<vmem>>, vector<8x256xf32>
    tpu.vector_store %arg8[%c0_27, %c0_28], %66 {strides = array<i32>} : memref<8x256xf32, #tpu.memory_space<vmem>>, vector<8x256xf32>,
    %c3_i32 = arith.constant 3 : i32
    %68 = arith.cmpi eq, %arg1, %c3_i32 : i32
    %69 = arith.extui %68 : i1 to i32
    %c0_i32_29 = arith.constant 0 : i32
    %70 = arith.cmpi ne, %69, %c0_i32_29 : i32
    scf.if %70 {
      %c0_30 = arith.constant 0 : index
      %c0_31 = arith.constant 0 : index
      %71 = vector.load %arg8[%c0_30, %c0_31] : memref<8x256xf32, #tpu.memory_space<vmem>>, vector<8x256xf32>
      %72 = vector.shape_cast %71 : vector<8x256xf32> to vector<1x8x256xf32>
      %cst_32 = arith.constant dense<0.000000e+00> : vector<1xf32>
      %73 = vector.multi_reduction <add>, %72, %cst_32 [1, 2] : vector<1x8x256xf32> to vector<1xf32>
      %74 = vector.shape_cast %73 : vector<1xf32> to vector<1x1x1xf32>
      %75 = vector.extract %74[0, 0, 0] : f32 from vector<1x1x1xf32>
      %76 = vector.broadcast %75 : f32 to vector<1x1x1xf32>
      %c0_33 = arith.constant 0 : index
      %c0_34 = arith.constant 0 : index
      %c0_35 = arith.constant 0 : index
      %77 = vector.load %arg7[%c0_33, %c0_34, %c0_35] : memref<1x1x1xf32, #tpu.memory_space<vmem>>, vector<1x1x1xf32>
      tpu.vector_store %arg7[%c0_33, %c0_34, %c0_35], %76 {strides = array<i32>} : memref<1x1x1xf32, #tpu.memory_space<vmem>>, vector<1x1x1xf32>,
    } else {
    }
    return
  }
  func.func @transform_0(%arg0: i32, %arg1: i32) -> (i32, i32) {
    %c0_i32 = arith.constant 0 : i32
    %c0_i32_0 = arith.constant 0 : i32
    %c0_i32_1 = arith.constant 0 : i32
    return %c0_i32, %c0_i32_0 : i32, i32
  }
  func.func @transform_1(%arg0: i32, %arg1: i32) -> (i32, i32) {
    %c0_i32 = arith.constant 0 : i32
    %c0_i32_0 = arith.constant 0 : i32
    %c0_i32_1 = arith.constant 0 : i32
    return %c0_i32, %c0_i32_0 : i32, i32
  }
  func.func @transform_2(%arg0: i32, %arg1: i32) -> (i32, i32) {
    %c0_i32 = arith.constant 0 : i32
    %c0_i32_0 = arith.constant 0 : i32
    %c0_i32_1 = arith.constant 0 : i32
    return %c0_i32, %c0_i32_0 : i32, i32
  }
  func.func @transform_3(%arg0: i32, %arg1: i32) -> (i32, i32) {
    %c4_i32 = arith.constant 4 : i32
    %0 = arith.muli %arg0, %c4_i32 : i32
    %1 = arith.addi %0, %arg1 : i32
    %c0_i32 = arith.constant 0 : i32
    %c0_i32_0 = arith.constant 0 : i32
    return %c0_i32, %1 : i32, i32
  }
  func.func @transform_4(%arg0: i32, %arg1: i32) -> (i32, i32) {
    %c4_i32 = arith.constant 4 : i32
    %0 = arith.muli %arg0, %c4_i32 : i32
    %1 = arith.addi %0, %arg1 : i32
    %c0_i32 = arith.constant 0 : i32
    %c0_i32_0 = arith.constant 0 : i32
    return %c0_i32, %1 : i32, i32
  }
  func.func @transform_5(%arg0: i32, %arg1: i32) -> (i32, i32, i32) {
    %c0_i32 = arith.constant 0 : i32
    %c0_i32_0 = arith.constant 0 : i32
    %c0_i32_1 = arith.constant 0 : i32
    return %arg0, %c0_i32, %c0_i32_0 : i32, i32, i32
  }
}

</mosaic_0001>

<bundles_post_ra>
// kernel: isdh_loss.1
= control target key start
LH: loop header
LB: loop body
LE: loop exit
PB: predicated region body
PF: predicated region fallthrough
CT: control target
= control target key end

     0   :  { %10 = vsyncpa [#allocation6], 0  ;;  %s926_s18 = smov 0   ;;  %s928_s19 = smov 0   ;;  %s1038_s0 = inlined_call_operand.vmem [shape: bf16[8,32], index: 0, kind: input, shape index: {}]   ;;  %s1039_s1 = inlined_call_operand.vmem [shape: bf16[8,16], index: 1, kind: input, shape index: {}]   ;;  %s1040_s2 = inlined_call_operand.vmem [shape: f32[8,1], index: 2, kind: input, shape index: {}]   ;;  %s1041_s3 = inlined_call_operand.vmem [shape: bf16[32,1024], index: 3, kind: input, shape index: {}]   ;;  %s1042_s4 = inlined_call_operand.vmem [shape: bf16[16,1024], index: 4, kind: input, shape index: {}]   ;;  %s1043_s5 = inlined_call_operand.hbm [shape: f32[1,1,1], index: 5, kind: output, shape index: {}]  }
   0x1   :  { %s930_s20 = smov 0   ;;  %s932_s21 = smov 0  }
   0x2   :  { %s934_s22 = smov 0  }
   0x3 LB: > { %s694_s23 = sadd.s32 4294967295, %s891_s22   ;;  %s25_s24 = sadd.s32 1, %s887_s21  ;;  %s891_s22 = sphi %s934_s22, %s16_s22   ;;  %s887_s21 = sphi %s932_s21, %s1048_s21   ;;  %s883_s20 = sphi %s930_s20, %s1047_s20   ;;  %s879_s19 = sphi %s928_s19, %s1046_s19   ;;  %s875_s18 = sphi %s926_s18, %s1045_s18  }
   0x4   : > { %p26_p0 = scmp.ge.s32.totalorder %s25_s24, 4  ;;  %p109_p1 = scmp.ne.s32.totalorder %s879_s19, %s875_s18 }
   0x5   : > { %p110_p2 = scmp.eq.s32.totalorder %s891_s22, 0  ;;  %s102_s27 = sadd.s32 1, %s879_s19 }
   0x6   : > { %s1050_s24 = smov (%p26_p0, %s25_s24), 0  ;;  %p696_p5 = scmp.ge.s32.totalorder %s891_s22, 4 }
   0x7   : > { %p958_p3 = por %p110_p2, %p109_p1  ;;  %s99_s26 = ssub.s32 %s887_s21, %s1050_s24 }
   0x8   : > { %p100_p4 = scmp.eq.s32.totalorder %s99_s26, 0  ;;  %200 = sbr.rel (%p696_p5) target bundleno = 27 (0x1b), region = 28 }
   0xa   : > { %s966_s28 = scalar_select %p100_p4, %s879_s19, %s102_s27  }
   0xd   : > { %203 = sbr.rel (!%p958_p3) target bundleno = 21 (0x15), region = 32  ;;  %s205_s29 = sand.u32 (%p958_p3), 1, %s879_s19  }
   0xe   : > { %s741_s30 = sshll.u32 (%p958_p3), %s887_s21, 3  ;;  %s697_s6 = sshll.u32 (%p958_p3), %s205_s29, 5 }
   0xf   : > { %s212_s9 = scalar_lea.vmem (%p958_p3), %s1041_s3, %s741_s30  ;;  %s207_s10 = scalar_lea.vmem (%p958_p3), [#allocation3], %s697_s6 }
  0x10   : > { %v247_v0 = vld [vmem:[%s212_s9] sm:$0xff] (%p958_p3) }
  0x11   : > { %v249_v1 = vld [vmem:[%s212_s9 + $0x20] sm:$0xff] (%p958_p3)  ;;  %248 = vst [vmem:[%s207_s10] sm:$0xff] (%p958_p3), %v247_v0 }
  0x12   : > { %v251_v2 = vld [vmem:[%s212_s9 + $0x40] sm:$0xff]  ;;  %250 = vst [vmem:[%s207_s10 + $0x8] sm:$0xff] %v249_v1 }
  0x13   : > { %v253_v3 = vld [vmem:[%s212_s9 + $0x60] sm:$0xff]  ;;  %252 = vst [vmem:[%s207_s10 + $0x10] sm:$0xff] %v251_v2 }
  0x14   : > { %254 = vst [vmem:[%s207_s10 + $0x18] sm:$0xff] %v253_v3 }
  0x15 PF: > { %260 = sbr.rel (!%p958_p3) target bundleno = 27 (0x1b), region = 70  ;;  %s262_s11 = sand.u32 (%p958_p3), 1, %s879_s19  }
  0x16   : > { %s742_s12 = sshll.u32 (%p958_p3), %s887_s21, 3  ;;  %s700_s13 = sshll.u32 (%p958_p3), %s262_s11, 4 }
  0x17   : > { %s269_s16 = scalar_lea.vmem (%p958_p3), %s1042_s4, %s742_s12  ;;  %s264_s17 = scalar_lea.vmem (%p958_p3), [#allocation4], %s700_s13 }
  0x18   : > { %v300_v4 = vld [vmem:[%s269_s16] sm:$0xff] (%p958_p3) }
  0x19   : > { %v302_v5 = vld [vmem:[%s269_s16 + $0x20] sm:$0xff] (%p958_p3)  ;;  %301 = vst [vmem:[%s264_s17] sm:$0xff] (%p958_p3), %v300_v4 }
  0x1a   : > { %303 = vst [vmem:[%s264_s17 + $0x8] sm:$0xff] %v302_v5 }
  0x1b PF: > { %p703_p6 = scmp.ge.s32.totalorder %s891_s22, 1  ;;  %p308_p7 = scmp.lt.s32.totalorder %s891_s22, 5 }
  0x1d   : > { %p309_p8 = pnand %p703_p6, %p308_p7 }
  0x1e   : > { %s315_s25 = sand.u32 (!%p309_p8), 1, %s875_s18   ;;  %p706_p9 = scmp.ne.s32.totalorder (!%p309_p8), %s883_s20, 0 }
  0x1f   : > { %312 = sbr.rel (%p309_p8) target bundleno = 420 (0x1a4), region = 108  ;;  %s704_s26 = sshll.u32 (!%p309_p8), %s315_s25, 5 }
  0x20   : > { %s705_s27 = sshll.u32 (!%p309_p8), %s315_s25, 4  ;;  %s317_s29 = scalar_lea.vmem (!%p309_p8), [#allocation3], %s704_s26 }
  0x21   : > { %s986_s30 = scalar_lea.vmem (!%p309_p8), [#allocation4], %s705_s27 }
  0x24   : > { %358 = sbr.rel (%p706_p9) target bundleno = 44 (0x2c), region = 120 }
  0x29   : > { %v893_v6 = vmov 0.0  }
  0x2a   : > { %359 = vst [vmem:[#allocation2] sm:$0xff] %v893_v6 }
  0x2b   : > { %360 = vst [vmem:[#allocation2 + $0x8] sm:$0xff] %v893_v6 }
  0x2c PF: > { %v728_v7 = vld [vmem:[%s317_s29 + $0x10] sm:$0xf]  ;;  %v748_v8 = vld [vmem:[%s317_s29 + $0x14] sm:$0xf0]  ;;  %v747_v9 = vld [vmem:[%s317_s29 + $0x14] sm:$0xf] }
  0x2d   : > { %v729_v10 = vor.u32 %v748_v8, %v728_v7  ;;  %v730_v11 = vld [vmem:[%s317_s29 + $0x18] sm:$0xf0]  ;;  %v720_v12 = vld [vmem:[%s317_s29] sm:$0xf]  ;;  %v746_v13 = vld [vmem:[%s317_s29 + $0x4] sm:$0xf0] }
  0x2e   : > { %v733_v14 = vor.u32 %v747_v9, %v730_v11  ;;  %v745_v15 = vld [vmem:[%s317_s29 + $0x4] sm:$0xf]  ;;  %v722_v16 = vld [vmem:[%s317_s29 + $0x8] sm:$0xf0]  ;;  %v721_v17 = vor.u32 %v746_v13, %v720_v12  ;;  %v710_v18 = vld [vmem:[%s986_s30] sm:$0xf] }
  0x2f   : > { %512 = vmatpush.bf16.msra.mxu2 %v729_v10  ;;  %v744_v19 = vld [vmem:[%s986_s30 + $0x4] sm:$0xf0]  ;;  %v725_v20 = vor.u32 %v745_v15, %v722_v16  ;;  %v743_v22 = vld [vmem:[%s986_s30 + $0x4] sm:$0xf]  ;;  %v712_v23 = vld [vmem:[%s986_s30 + $0x8] sm:$0xf0] }
  0x30   : > { %525 = vmatpush.bf16.msra.mxu3 %v733_v14  ;;  %v711_v21 = vor.u32 %v744_v19, %v710_v18  ;;  %v894_v24 = vmov 0   ;;  %v453_v25 = vld [vmem:[%s1040_s2] sm:$0xff]  ;;  %v715_v26 = vor.u32 %v743_v22, %v712_v23  ;;  %vm377_vm0 = vcmask 130048   ;;  %v366_v30 = vld [vmem:[%s986_s30 + $0x8] sm:$0xff]  ;;  %s707_s11 = sshll.u32 %s883_s20, 8  ;;  %p736_p10 = scmp.ne.s32.totalorder %s883_s20, 3 }
  0x31   : > { %800 = vset.pattern.permute.xlu0 %v894_v24  ;;  %v364_v27 = vld [vmem:[%s1039_s1] sm:$0xf]  ;;  %vm502_vm1 = vcmask 261120   ;;  %v409_v32 = vunpack.c.l.bf16 %v366_v30  ;;  %v410_v34 = vunpack.c.h.bf16 %v366_v30 }
  0x32   : > { %456 = vperm.xlu0 %800, %v453_v25   ;;  %388 = vmatpush.bf16.msra.mxu0 %v711_v21  ;;  %v477_v28 = vld [vmem:[%s1038_s0] sm:$0xf] }
  0x33   : > { %513 = vmatpush.bf16.msra.mxu2 %v721_v17  ;;  %401 = vmatpush.bf16.msra.mxu1 %v715_v26  ;;  %v365_v29 = vld [vmem:[%s986_s30] sm:$0xff]  ;;  %v413_v36 = vmul.f32 %v409_v32, %v409_v32  ;;  %v414_v38 = vmul.f32 %v410_v34, %v410_v34 }
  0x34   : > { %526 = vmatpush.bf16.msra.mxu3 %v725_v20  ;;  %v407_v31 = vunpack.c.l.bf16 %v365_v29  ;;  %v408_v33 = vunpack.c.h.bf16 %v365_v29 }
  0x35   : > { %716 = vmatmul.msk.bf16.vlgmr.msra.gmra.mxu0 %vm377_vm0, %v364_v27 }
  0x36   : > { %734 = vmatmul.msk.bf16.vlgmr.msra.gmra.mxu2 %vm502_vm1, %v477_v28  ;;  %717 = vmatmul.msk.bf16.vlgmr.msra.gmra.mxu1 %vm377_vm0, %v364_v27  ;;  %v411_v35 = vmul.f32 %v407_v31, %v407_v31  ;;  %v412_v37 = vmul.f32 %v408_v33, %v408_v33  ;;  %v572_v33 = vlaneseq }
  0x37   : > { %735 = vmatmul.msk.bf16.vlgmr.msra.gmra.mxu3 %vm502_vm1, %v477_v28 }
  0x38   : > { %v415_v39 = vadd.f32 %v413_v36, %v411_v35  ;;  %v422_v40 = vadd.f32 %v414_v38, %v412_v37  ;;  %v573_v37 = vand.u32 127, %v572_v33 }
  0x3a   : > { %v416_v41 = vrot.slane %v415_v39, 4  ;;  %v423_v42 = vrot.slane %v422_v40, 4 }
  0x3c   : > { %v417_v43 = vadd.f32 %v416_v41, %v415_v39  ;;  %v424_v44 = vadd.f32 %v423_v42, %v422_v40  ;;  %v575_v41 = vstv %s707_s11 }
  0x3e   : > { %v418_v45 = vrot.slane %v417_v43, 2  ;;  %v425_v46 = vrot.slane %v424_v44, 2 }
  0x40   : > { %v419_v47 = vadd.f32 %v418_v45, %v417_v43  ;;  %v426_v48 = vadd.f32 %v425_v46, %v424_v44 }
  0x42   : > { %v420_v49 = vrot.slane %v419_v47, 1  ;;  %v427_v50 = vrot.slane %v426_v48, 1 }
  0x44   : > { %v421_v51 = vadd.f32 %v420_v49, %v419_v47  ;;  %v428_v52 = vadd.f32 %v427_v50, %v426_v48  ;;  %v574_v50 = vadd.s32 128, %v573_v37 }
  0x46   : > { %801 = vrsqrt.f32 %v421_v51  ;;  %vm436_vm2 = vcmp.eq.f32.partialorder %v421_v51, inf  ;;  %v439_v5 = vand.u32 2147483648, %v421_v51  ;;  %vm448_vm3 = vcmp.eq.f32.partialorder %v428_v52, inf }
  0x47   : > { %803 = vrsqrt.f32 %v428_v52  ;;  %vm438_vm4 = vcmp.eq.f32.partialorder %v421_v51, 0.0  ;;  %v451_v7 = vand.u32 2147483648, %v428_v52  ;;  %vm450_vm5 = vcmp.eq.f32.partialorder %v428_v52, 0.0 }
  0x4c   : > { %v802_v53 = vpop.eup %801 }
  0x4d   : > { %v804_v54 = vpop.eup %803  ;;  %v430_v55 = vmul.f32 %v802_v53, %v421_v51 }
  0x4e   : > { %v442_v56 = vmul.f32 %v804_v54, %v428_v52 }
  0x4f   : > { %v431_v57 = vmul.f32 %v802_v53, %v430_v55 }
  0x50   : > { %v443_v58 = vmul.f32 %v804_v54, %v442_v56 }
  0x51   : > { %v432_v59 = vmul.f32 0.5, %v431_v57 }
  0x52   : > { %v444_v60 = vmul.f32 0.5, %v443_v58 }
  0x53   : > { %v433_v61 = vsub.f32 1.5, %v432_v59 }
  0x54   : > { %v445_v62 = vsub.f32 1.5, %v444_v60 }
  0x55   : > { %v434_v63 = vmul.f32 %v802_v53, %v433_v61 }
  0x56   : > { %v446_v0 = vmul.f32 %v804_v54, %v445_v62  ;;  %v576_v54 = vadd.s32 %v575_v41, %v573_v37 }
  0x57   : > { %v435_v3 = vmul.f32 %v434_v63, %v421_v51 }
  0x58   : > { %v447_v4 = vmul.f32 %v446_v0, %v428_v52  ;;  %vm580_vm12 = vcmp.lt.s32.totalorder %v576_v54, 1000 }
  0x59   : > { %v437_v6 = vsel %vm436_vm2, %v421_v51, %v435_v3  ;;  %v577_v3 = vadd.s32 %v575_v41, %v574_v50 }
  0x5a   : > { %v449_v9 = vsel %vm448_vm3, %v428_v52, %v447_v4  ;;  %v440_v14 = vsel %vm438_vm4, %v439_v5, %v437_v6 }
  0x5b   : > { %v452_v18 = vsel %vm450_vm5, %v451_v7, %v449_v9  ;;  %vm581_vm14 = vcmp.lt.s32.totalorder %v577_v3, 1000 }
  0xa4   : > { %v457_v13 = vpop.permute.xlu0 %456 }
  0xa5   : > { %v459_v20 = vmul.f32 %v457_v13, %v440_v14  ;;  %v460_v23 = vmul.f32 %v457_v13, %v452_v18  ;;  %v579_v13 = vld [vmem:[#allocation2 + $0x8] sm:$0xff] }
  0xa7   : > { %v461_v27 = vadd.f32 1e-05, %v459_v20  ;;  %v462_v29 = vadd.f32 1e-05, %v460_v23 }
  0xa9   : > { %v463_v39 = vmul.f32 0.99, %v461_v27  ;;  %v467_v40 = vmul.f32 0.01, %v461_v27  ;;  %v464_v43 = vmul.f32 0.99, %v462_v29 }
  0xaa   : > { %v468_v44 = vmul.f32 0.01, %v462_v29 }
  0xb2   : > { %v1004_v1 = vpop.f32.mrf.mxu0 }
  0xb3   : > { %v1006_v2 = vpop.f32.mrf.mxu1  ;;  %vm465_vm8 = vcmp.gt.f32.partialorder %v1004_v1, %v463_v39  ;;  %vm469_vm9 = vcmp.lt.f32.partialorder %v1004_v1, %v467_v40 }
  0xb4   : > { %vm466_vm10 = vcmp.gt.f32.partialorder %v1006_v2, %v464_v43  ;;  %vm470_vm11 = vcmp.lt.f32.partialorder %v1006_v2, %v468_v44  ;;  %vm471_vm13 = vmor %vm465_vm8, %vm469_vm9 }
  0xb5   : > { %vm472_vm15 = vmor %vm466_vm10, %vm470_vm11 }
  0xb9   : > { %v515_v8 = vpop.f32.mrf.mxu2 }
  0xba   : > { %v532_v10 = vmul.f32 0.15625, %v515_v8  ;;  %v528_v11 = vpop.f32.mrf.mxu3  ;;  %v392_v12 = vpop.f32.mrf.mxu0  ;;  %v578_v8 = vld [vmem:[#allocation2] sm:$0xff] }
  0xbb   : > { %v533_v15 = vmul.f32 0.15625, %v528_v11  ;;  %v405_v16 = vpop.f32.mrf.mxu1 }
  0xbc   : > { %v534_v17 = vand.u32 2147483647, %v532_v10  ;;  %vm556_vm6 = vcmp.ge.f32.partialorder %v532_v10, 0.0  ;;  %v548_v48 = vmax.f32 %v532_v10, 0.0 }
  0xbd   : > { %v535_v19 = vand.u32 2147483647, %v533_v15  ;;  %vm557_vm7 = vcmp.ge.f32.partialorder %v533_v15, 0.0  ;;  %v549_v58 = vmax.f32 %v533_v15, 0.0 }
  0xbe   : > { %v536_v21 = vsub.f32 0.0, %v534_v17 }
  0xbf   : > { %v537_v22 = vsub.f32 0.0, %v535_v19 }
  0xc0   : > { %v538_v24 = vmul.f32 1.442695, %v536_v21 }
  0xc1   : > { %v540_v25 = vmul.f32 1.442695, %v537_v22  ;;  %v517_v26 = vpop.f32.mrf.mxu2 }
  0xc2   : > { %805 = vpow2.f32 %v538_v24  ;;  %v530_v28 = vpop.f32.mrf.mxu3 }
  0xc3   : > { %807 = vpow2.f32 %v540_v25 }
  0xc4   : > { %809 = vrcp.f32 %v461_v27 }
  0xc5   : > { %811 = vrcp.f32 %v462_v29 }
  0xc8   : > { %v806_v30 = vpop.eup %805 }
  0xc9   : > { %v808_v31 = vpop.eup %807  ;;  %v542_v32 = vadd.f32 1.0, %v806_v30  ;;  %v558_v49 = vsel %vm556_vm6, 1.0, %v806_v30 }
  0xca   : > { %v543_v34 = vadd.f32 1.0, %v808_v31  ;;  %v810_v35 = vpop.eup %809  ;;  %v559_v59 = vsel %vm557_vm7, 1.0, %v808_v31 }
  0xcb   : > { %813 = vlog2.f32 %v542_v32  ;;  %v812_v36 = vpop.eup %811  ;;  %v475_v38 = vmul.f32 %v810_v35, %v1004_v1 }
  0xcc   : > { %815 = vrcp.f32 %v542_v32  ;;  %v476_v45 = vmul.f32 %v812_v36, %v1006_v2 }
  0xcd   : > { %817 = vlog2.f32 %v543_v34  ;;  %v552_v52 = vmul.f32 %v532_v10, %v475_v38 }
  0xce   : > { %819 = vrcp.f32 %v543_v34  ;;  %v553_v0 = vmul.f32 %v533_v15, %v476_v45 }
  0xd1   : > { %v814_v42 = vpop.eup %813 }
  0xd2   : > { %v816_v46 = vpop.eup %815  ;;  %v545_v47 = vmul.f32 0.6931472, %v814_v42 }
  0xd3   : > { %v818_v51 = vpop.eup %817  ;;  %v562_v53 = vmul.f32 %v816_v46, %v558_v49 }
  0xd4   : > { %v820_v55 = vpop.eup %819  ;;  %v550_v56 = vadd.f32 %v548_v48, %v545_v47  ;;  %v547_v57 = vmul.f32 0.6931472, %v818_v51 }
  0xd5   : > { %v564_v60 = vsub.f32 %v475_v38, %v562_v53  ;;  %v563_v61 = vmul.f32 %v820_v55, %v559_v59 }
  0xd6   : > { %v554_v62 = vsub.f32 %v550_v56, %v552_v52  ;;  %v551_v63 = vadd.f32 %v549_v58, %v547_v57 }
  0xd7   : > { %v565_v4 = vsub.f32 %v476_v45, %v563_v61  ;;  %v566_v5 = vmul.f32 %v564_v60, %v564_v60 }
  0xd8   : > { %v568_v6 = vmul.f32 10.0, %v554_v62  ;;  %v555_v7 = vsub.f32 %v551_v63, %v553_v0 }
  0xd9   : > { %v567_v10 = vmul.f32 %v565_v4, %v565_v4 }
  0xda   : > { %v570_v9 = vsel %vm471_vm13, %v568_v6, %v566_v5  ;;  %v569_v11 = vmul.f32 10.0, %v555_v7 }
  0xdb   : > { %v582_v12 = vsel %vm580_vm12, %v570_v9, 0.0 }
  0xdc   : > { %v584_v14 = vadd.f32 %v582_v12, %v578_v8  ;;  %v571_v15 = vsel %vm472_vm15, %v569_v11, %v567_v10  ;;  %591 = sbr.rel (%p736_p10) target bundleno = 414 (0x19e), region = 124 }
  0xdd   : > { %v583_v16 = vsel %vm581_vm14, %v571_v15, 0.0 }
  0xde   : > { %586 = vst [vmem:[#allocation2] sm:$0xff] %v584_v14  ;;  %v585_v2 = vadd.f32 %v583_v16, %v579_v13 }
  0xe0   : > { %587 = vst [vmem:[#allocation2 + $0x8] sm:$0xff] %v585_v2 }
  0xe1   : > { %vm605_vm0 = vcmask 0  }
  0xe5   : > { %v592_v17 = vld [vmem:[#allocation2] sm:$0xff] }
  0xe7   : > { %v593_v1 = vld [vmem:[#allocation2 + $0x8] sm:$0xff] }
  0xe8   : > { %v594_v18 = vadd.f32 %v593_v1, %v592_v17 }
  0xea   : > { %595 = vadd.xlane.f32.xlu0 %v594_v18 }
 0x15d   : > { %v596_v19 = vpop.xlane.xlu0 %595 }
 0x15e   : > { %v597_v20 = vrot.slane %v596_v19, 4 }
 0x160   : > { %v598_v21 = vadd.f32 %v597_v20, %v596_v19 }
 0x162   : > { %v599_v22 = vrot.slane %v598_v21, 2 }
 0x164   : > { %v600_v23 = vadd.f32 %v599_v22, %v598_v21 }
 0x166   : > { %v601_v24 = vrot.slane %v600_v23, 1 }
 0x168   : > { %v602_v25 = vadd.f32 %v601_v24, %v600_v23 }
 0x16a   : > { %749 = vpush %v602_v25 }
 0x19b   : > { %s750_s12 = spop %749 }
 0x19c   : > { %v604_v26 = vstv %s750_s12 }
 0x19d   : > { %606 = vst.msk [vmem:[#allocation5] sm:$0x1] %vm605_vm0, %v604_v26 }
 0x19e PF: > { %p755_p11 = scmp.eq.s32.totalorder %s694_s23, 3  ;;  %s616_s14 = sshll.u32 %s1043_s5, 4  ;;  %s617_s14 = int_to_ptr.hbm [resolvable:$true] %s616_s14 }
 0x19f   : > { %s895_s15 = smov [#allocation5]  }
 0x1a0   : > { %s614_s16 = sshll.u32 %s895_s15, 4  ;;  %s615_s16 = int_to_ptr.vmem [resolvable:$true] %s614_s16 }
 0x1a1   : > { %752 = dma.vmem_to_hbm [thread:$0]  (%p755_p11), %s615_s16, 16, %s617_s14, [#allocation6]  }
 0x1a2   : > { %870 = dma.done.wait (%p755_p11), [#allocation6], 16  }
 0x1a3   : > { %872 = vsyncadd (%p755_p11), [#allocation6], 4294967280 }
 0x1a4 PF: > { %s16_s22 = sadd.s32 1, %s891_s22   ;;  %s1045_s18 = smov %s879_s19 }
 0x1a5   : > { %p13_p12 = scmp.ge.s32.totalorder %s16_s22, 6   ;;  %s1046_s19 = smov %s966_s28 }
 0x1a6   : > { %s1047_s20 = smov %s887_s21  ;;  %s1048_s21 = smov %s1050_s24 }
 0x1a7   :  { %15 = sbr.rel (!%p13_p12) target bundleno = 3 (0x3), region = 165 }
 0x1ac   :  { %630 = vsyncpa [#allocation6], 1 }
 0x1ad   :  { %632 = vsyncpa [#allocation6 + $0x1], 1 }

</bundles_post_ra>
